<compile_context>
chip_gen: v6e
topology: v6e:2x2x1
jax: 0.10.0
libtpu: 0.0.40
codegen_flags: <defaults>
</compile_context>

<pallas_src>
import functools

import jax
import jax.numpy as jnp
from jax import lax
from jax.experimental import pallas as pl
from jax.experimental.pallas import tpu as pltpu

LANES = 128   # lane-pad fc1's class dim for the in-kernel MXU matmul
TILE_N = 8    # tokens per grid step (multiple of 8 -> sublane aligned)


def bias_predictor_kernel(ids_ref, emb_ref, w_ref, b_ref, out_ref):
    """One row-tile of the BiasPredictor forward.

    ids_ref: (TILE_N, 1) int32  -- token ids for this tile
    emb_ref: (V, E)      f32    -- full embedding table, VMEM resident
    w_ref:   (E, LANES)  f32    -- fc1 weight, transposed + lane-padded
    b_ref:   (1, LANES)  f32    -- fc1 bias, lane-padded
    out_ref: (TILE_N, C) f32    -- logits for this tile (C = num_classes)
    """
    tile_n = ids_ref.shape[0]
    vocab = emb_ref.shape[0]
    num_classes = out_ref.shape[1]

    # Embedding lookup as an in-VMEM one-hot gather on the MXU (no per-row DMA).
    lane_ids = lax.broadcasted_iota(jnp.int32, (tile_n, vocab), 1)
    onehot = (ids_ref[...] == lane_ids).astype(emb_ref.dtype)        # (TILE_N, V)
    x = jnp.dot(onehot, emb_ref[...], preferred_element_type=jnp.float32)

    # grad_reverse is identity in the forward pass.
    # TODO(synk): GradReverse backward (grad * -0.1) needs a jax.custom_vjp
    # wrapper if this kernel is ever differentiated (adversarial training).

    # fc1: x @ W^T + b, computed lane-dense (LANES wide) on the MXU; only the
    # real num_classes columns are written back (no 64x padded HBM traffic).
    logits = jnp.dot(x, w_ref[...], preferred_element_type=jnp.float32)
    logits = logits + b_ref[...]
    out_ref[...] = logits[:, :num_classes].astype(out_ref.dtype)


def prepare_bias_predictor_params(emb_table, fc1_weight, fc1_bias):
    """One-time parameter prep (hoisted out of the per-call path): transpose +
    lane-pad fc1 so the in-kernel matmul output is lane-dense."""
    emb_table = emb_table.astype(jnp.float32)
    c, e = fc1_weight.shape
    w_pad = jnp.zeros((e, LANES), jnp.float32).at[:, :c].set(
        fc1_weight.T.astype(jnp.float32))
    b_pad = jnp.zeros((1, LANES), jnp.float32).at[:, :c].set(
        fc1_bias.astype(jnp.float32))
    return emb_table, w_pad, b_pad


@functools.partial(jax.jit, static_argnames=("num_classes",))
def bias_predictor_forward(token_ids, emb_table, w_pad, b_pad, *, num_classes):
    """token_ids: (B, S) int; emb_table: (V, E) f32; w_pad: (E, 128);
    b_pad: (1, 128). Returns logits of shape (B*S, num_classes)."""
    B, S = token_ids.shape
    V, E = emb_table.shape
    N = B * S

    # This kernel keeps the whole table VMEM-resident; for large vocabularies
    # switch to a scalar-prefetched, Element-indexed row gather instead.
    assert V * E * 4 <= 8 * 1024 * 1024, "embedding table too large for VMEM gather"

    # Clamp ids so the lookup matches JAX gather semantics for bad ids.
    ids = jnp.clip(token_ids.reshape(N, 1).astype(jnp.int32), 0, V - 1)

    # Pad the token dim to a multiple of TILE_N; padded rows are sliced off.
    n_pad = ((N + TILE_N - 1) // TILE_N) * TILE_N
    ids = jnp.pad(ids, ((0, n_pad - N), (0, 0)))

    out = pl.pallas_call(
        bias_predictor_kernel,
        out_shape=jax.ShapeDtypeStruct((n_pad, num_classes), jnp.float32),
        grid=(n_pad // TILE_N,),
        in_specs=[
            pl.BlockSpec((TILE_N, 1), lambda i: (i, 0)),   # ids tile
            pl.BlockSpec((V, E), lambda i: (0, 0)),        # table (resident)
            pl.BlockSpec((E, LANES), lambda i: (0, 0)),    # fc1 weight
            pl.BlockSpec((1, LANES), lambda i: (0, 0)),    # fc1 bias
        ],
        out_specs=pl.BlockSpec((TILE_N, num_classes), lambda i: (i, 0)),
        compiler_params=pltpu.CompilerParams(
            dimension_semantics=("parallel",)),
    )(ids, emb_table, w_pad, b_pad)

    return out[:N]


def reference_forward(token_ids, emb_table, fc1_weight, fc1_bias):
    x = emb_table[token_ids]                 # (B, S, E)
    x = x.reshape(-1, emb_table.shape[1])    # (B*S, E)
    return x @ fc1_weight.T + fc1_bias


if __name__ == "__main__":
    # Small, deterministic setup consistent with the module.
    B, S = 2, 8          # batch, sequence
    V, E = 64, 32        # vocab size, emb_size
    C = 2                # num_classes

    key = jax.random.PRNGKey(0)
    k_ids, k_emb, k_w, k_b = jax.random.split(key, 4)

    token_ids = jax.random.randint(k_ids, (B, S), 0, V, dtype=jnp.int32)

    # nn.Embedding default init: N(0, 1)
    emb_table = jax.random.normal(k_emb, (V, E), dtype=jnp.float32)

    # nn.Linear default init: U(-1/sqrt(E), 1/sqrt(E)) for weight and bias
    bound = 1.0 / (E ** 0.5)
    fc1_weight = jax.random.uniform(k_w, (C, E), minval=-bound, maxval=bound,
                                    dtype=jnp.float32)
    fc1_bias = jax.random.uniform(k_b, (C,), minval=-bound, maxval=bound,
                                  dtype=jnp.float32)

    table, w_pad, b_pad = prepare_bias_predictor_params(
        emb_table, fc1_weight, fc1_bias)

    logits = bias_predictor_forward(token_ids, table, w_pad, b_pad,
                                    num_classes=C)
    logits = jax.block_until_ready(logits)

    ref = reference_forward(token_ids, emb_table, fc1_weight, fc1_bias)
    assert logits.shape == (B * S, C), logits.shape
    max_err = float(jnp.max(jnp.abs(logits - ref)))
    assert jnp.allclose(logits, ref, atol=1e-4, rtol=1e-4), max_err

    print("KERNEL_OK")
</pallas_src>

<mosaic_0001>
module attributes {stable_mosaic.version = 11 : i64} {
  func.func @bias_predictor_kernel(%arg0: i32, %arg1: memref<8x1xi32, #tpu.memory_space<vmem>>, %arg2: memref<64x32xf32, #tpu.memory_space<vmem>>, %arg3: memref<32x128xf32, #tpu.memory_space<vmem>>, %arg4: memref<1x128xf32, #tpu.memory_space<vmem>>, %arg5: memref<8x2xf32, #tpu.memory_space<vmem>>) attributes {dimension_semantics = [#tpu.dimension_semantics<parallel>], iteration_bounds = array<i64: 2>, scalar_prefetch = 0 : i64, scratch_operands = 0 : i64, tpu.core_type = #tpu.core_type<tc>, window_params = [{transform_indices = @transform_0, window_bounds = array<i64: 8, 1>}, {pipeline_mode = #tpu.pipeline_mode<synchronous>, transform_indices = @transform_1, window_bounds = array<i64: 64, 32>}, {pipeline_mode = #tpu.pipeline_mode<synchronous>, transform_indices = @transform_2, window_bounds = array<i64: 32, 128>}, {pipeline_mode = #tpu.pipeline_mode<synchronous>, transform_indices = @transform_3, window_bounds = array<i64: 1, 128>}, {transform_indices = @transform_4, window_bounds = array<i64: 8, 2>}]} {
    %0 = tpu.iota {dimensions = array<i32: 1>} : vector<8x64xi32>
    %c0 = arith.constant 0 : index
    %c0_0 = arith.constant 0 : index
    %1 = vector.load %arg1[%c0, %c0_0] : memref<8x1xi32, #tpu.memory_space<vmem>>, vector<8x1xi32>
    %2 = vector.broadcast %1 : vector<8x1xi32> to vector<8x64xi32>
    %3 = arith.cmpi eq, %2, %0 : vector<8x64xi32>
    %4 = arith.extui %3 : vector<8x64xi1> to vector<8x64xi32>
    %5 = arith.sitofp %4 : vector<8x64xi32> to vector<8x64xf32>
    %c0_1 = arith.constant 0 : index
    %c0_2 = arith.constant 0 : index
    %6 = vector.load %arg2[%c0_1, %c0_2] : memref<64x32xf32, #tpu.memory_space<vmem>>, vector<64x32xf32>
    %cst = arith.constant dense<0.000000e+00> : vector<8x32xf32>
    %7 = tpu.matmul %5, %6, %cst {dimension_numbers = #tpu.dot_dimension_numbers<[1], [0], [0], [1], [0, 0, 1, 1], [], []>} : vector<8x64xf32>, vector<64x32xf32>, vector<8x32xf32> -> vector<8x32xf32>
    %c0_3 = arith.constant 0 : index
    %c0_4 = arith.constant 0 : index
    %8 = vector.load %arg3[%c0_3, %c0_4] : memref<32x128xf32, #tpu.memory_space<vmem>>, vector<32x128xf32>
    %cst_5 = arith.constant dense<0.000000e+00> : vector<8x128xf32>
    %9 = tpu.matmul %7, %8, %cst_5 {dimension_numbers = #tpu.dot_dimension_numbers<[1], [0], [0], [1], [0, 0, 1, 1], [], []>} : vector<8x32xf32>, vector<32x128xf32>, vector<8x128xf32> -> vector<8x128xf32>
    %c0_6 = arith.constant 0 : index
    %c0_7 = arith.constant 0 : index
    %10 = vector.load %arg4[%c0_6, %c0_7] : memref<1x128xf32, #tpu.memory_space<vmem>>, vector<1x128xf32>
    %11 = vector.broadcast %10 : vector<1x128xf32> to vector<8x128xf32>
    %12 = arith.addf %9, %11 : vector<8x128xf32>
    %13 = vector.extract_strided_slice %12 {offsets = [0, 0], sizes = [8, 2], strides = [1, 1]} : vector<8x128xf32> to vector<8x2xf32>
    %c0_8 = arith.constant 0 : index
    %c0_9 = arith.constant 0 : index
    %14 = vector.load %arg5[%c0_8, %c0_9] : memref<8x2xf32, #tpu.memory_space<vmem>>, vector<8x2xf32>
    tpu.vector_store %arg5[%c0_8, %c0_9], %13 {strides = array<i32>} : memref<8x2xf32, #tpu.memory_space<vmem>>, vector<8x2xf32>,
    return
  }
  func.func @transform_0(%arg0: i32) -> (i32, i32) {
    %c0_i32 = arith.constant 0 : i32
    %c0_i32_0 = arith.constant 0 : i32
    return %arg0, %c0_i32 : i32, i32
  }
  func.func @transform_1(%arg0: i32) -> (i32, i32) {
    %c0_i32 = arith.constant 0 : i32
    %c0_i32_0 = arith.constant 0 : i32
    %c0_i32_1 = arith.constant 0 : i32
    return %c0_i32, %c0_i32_0 : i32, i32
  }
  func.func @transform_2(%arg0: i32) -> (i32, i32) {
    %c0_i32 = arith.constant 0 : i32
    %c0_i32_0 = arith.constant 0 : i32
    %c0_i32_1 = arith.constant 0 : i32
    return %c0_i32, %c0_i32_0 : i32, i32
  }
  func.func @transform_3(%arg0: i32) -> (i32, i32) {
    %c0_i32 = arith.constant 0 : i32
    %c0_i32_0 = arith.constant 0 : i32
    %c0_i32_1 = arith.constant 0 : i32
    return %c0_i32, %c0_i32_0 : i32, i32
  }
  func.func @transform_4(%arg0: i32) -> (i32, i32) {
    %c0_i32 = arith.constant 0 : i32
    %c0_i32_0 = arith.constant 0 : i32
    return %arg0, %c0_i32 : i32, i32
  }
}

</mosaic_0001>

<bundles_post_ra>
// kernel: bias_predictor_forward.1
= control target key start
LH: loop header
LB: loop body
LE: loop exit
PB: predicated region body
PF: predicated region fallthrough
CT: control target
= control target key end

     0   :  { %s529_s15 = smov 0   ;;  %s592_s0 = inlined_call_operand.vmem [shape: s32[16,1], index: 0, kind: input, shape index: {}]   ;;  %s593_s1 = inlined_call_operand.vmem [shape: f32[64,32], index: 1, kind: input, shape index: {}]   ;;  %s594_s2 = inlined_call_operand.vmem [shape: f32[32,128], index: 2, kind: input, shape index: {}]   ;;  %s595_s3 = inlined_call_operand.vmem [shape: f32[1,128], index: 3, kind: input, shape index: {}]   ;;  %s596_s4 = inlined_call_operand.vmem [shape: f32[16,2], index: 4, kind: output, shape index: {}]  }
   0x1 LB: > { %s424_s16 = sadd.s32 4294967295, %s499_s15   ;;  %p428_p0 = scmp.ge.s32.totalorder %s499_s15, 1  ;;  %s499_s15 = sphi %s529_s15, %s14_s15  }
   0x2   : > { %p161_p1 = scmp.lt.s32.totalorder %s499_s15, 3 }
   0x4   : > { %p162_p2 = pnand %p428_p0, %p161_p1 }
   0x5   : > { %p185_p3 = scmp.lt.s32.totalorder (!%p162_p2), %s424_s16, 1 }
   0x6   : > { %165 = sbr.rel (%p162_p2) target bundleno = 532 (0x214), region = 36 }
   0xb   : > { %v209_v0 = vld [vmem:[%s593_s1 + $0x38] sm:$0xff]  ;;  %v501_v1 = vmov 0   ;;  %v502_v2 = vmov 0.0   ;;  %v208_v3 = vld [vmem:[%s593_s1 + $0x30] sm:$0xff]  ;;  %s598_s16 = smov (!%p185_p3, %s424_s16), 1  ;;  %v207_v4 = vld [vmem:[%s593_s1 + $0x28] sm:$0xff]  ;;  %v193_v14 = vlaneseq }
   0xc   : > { %492 = vset.pattern.permute.xlu0 %v501_v1  ;;  %451 = vmatprep.subr.mxu0 %v502_v2  ;;  %s429_s23 = sshll.u32 %s598_s16, 3  ;;  %vm503_vm0 = vmmov 0   ;;  %v206_v5 = vld [vmem:[%s593_s1 + $0x20] sm:$0xff]  ;;  %v287_v6 = vld [vmem:[%s594_s2 + $0x18] sm:$0xff]  ;;  %v286_v8 = vld [vmem:[%s594_s2 + $0x10] sm:$0xff]  ;;  %vm210_vm1 = vcmask 523264  }
   0xd   : > { %452 = vmatpush3.msra.mxu0 %v209_v0  ;;  %470 = vmatprep.subr.mxu1 %v502_v2  ;;  %s188_s26 = scalar_lea.vmem %s592_s0, %s429_s23  ;;  %v205_v9 = vld [vmem:[%s593_s1 + $0x18] sm:$0xff]  ;;  %v285_v10 = vld [vmem:[%s594_s2 + $0x8] sm:$0xff]  ;;  %v204_v11 = vld [vmem:[%s593_s1 + $0x10] sm:$0xff]  ;;  %v194_v15 = vand.u32 127, %v193_v14  ;;  %vm295_vm3 = vcmask 261120   ;;  %vm369_vm4 = vcmask 15360  }
   0xe   : > { %453 = vmatprep.subr.mxu0 %v502_v2  ;;  %467 = vmatprep.mubr.msk.f32.mxu0 %vm503_vm0, %v502_v2  ;;  %v195_v7 = vld [vmem:[%s188_s26] sm:$0xff]  ;;  %v203_v12 = vld [vmem:[%s593_s1 + $0x8] sm:$0xff]  ;;  %s192_s26 = scalar_lea.vmem %s596_s4, %s429_s23 }
   0xf   : > { %454 = vmatpush3.msra.mxu0 %v208_v3  ;;  %478 = vmatprep.mubr.msk.f32.mxu1 %vm503_vm0, %v502_v2  ;;  %v202_v13 = vld [vmem:[%s593_s1] sm:$0xff] }
  0x10   : > { %455 = vmatprep.subr.mxu0 %v502_v2  ;;  %471 = vmatpush3.msra.mxu1 %v287_v6  ;;  %v284_v18 = vld [vmem:[%s594_s2] sm:$0xff] }
  0x11   : > { %456 = vmatpush3.msra.mxu0 %v207_v4  ;;  %197 = vperm.xlu0 %492, %v195_v7   ;;  %v433_v21 = vld [vmem:[%s595_s3] ss:$0 sm:$0xff] }
  0x12   : > { %457 = vmatprep.subr.mxu0 %v502_v2  ;;  %472 = vmatprep.subr.mxu1 %v502_v2 }
  0x13   : > { %458 = vmatpush3.msra.mxu0 %v206_v5  ;;  %473 = vmatpush3.msra.mxu1 %v286_v8 }
  0x14   : > { %459 = vmatprep.subr.mxu0 %v502_v2  ;;  %474 = vmatprep.subr.mxu1 %v502_v2 }
  0x15   : > { %460 = vmatpush3.msra.mxu0 %v205_v9  ;;  %475 = vmatpush3.msra.mxu1 %v285_v10 }
  0x16   : > { %461 = vmatprep.subr.mxu0 %v502_v2  ;;  %476 = vmatprep.subr.mxu1 %v502_v2 }
  0x17   : > { %462 = vmatpush3.msra.mxu0 %v204_v11  ;;  %477 = vmatpush3.msra.mxu1 %v284_v18 }
  0x18   : > { %463 = vmatprep.subr.mxu0 %v502_v2 }
  0x19   : > { %464 = vmatpush3.msra.mxu0 %v203_v12 }
  0x1a   : > { %465 = vmatprep.subr.mxu0 %v502_v2 }
  0x1b   : > { %466 = vmatpush3.msra.mxu0 %v202_v13 }
  0x8c   : > { %v198_v16 = vpop.permute.xlu0 %197 }
  0x8d   : > { %vm199_vm2 = vcmp.eq.s32.totalorder %v198_v16, %v194_v15 }
  0x8e   : > { %v431_v17 = vsel %vm199_vm2, 1.0, %v502_v2 }
  0x8f   : > { %468 = vmatmul.mubr.msk.f32.vlgmr.msra.gmra.mxu0 %vm210_vm1, %v431_v17 }
 0x14f   : > { %v280_v19 = vpop.f32.mrf.mxu0 }
 0x150   : > { %479 = vmatmul.mubr.msk.f32.vlgmr.msra.gmra.mxu1 %vm295_vm3, %v280_v19 }
 0x151   : > { %v469_v20 = vpop.f32.mrf.mxu0 }
 0x210   : > { %v365_v22 = vpop.f32.mrf.mxu1 }
 0x211   : > { %v366_v23 = vadd.f32 %v433_v21, %v365_v22 }
 0x212   : > { %v480_v24 = vpop.f32.mrf.mxu1 }
 0x213   : > { %370 = vst.msk [vmem:[%s192_s26] sm:$0xff] %vm369_vm4, %v366_v23 }
 0x214 PF: > { %s14_s15 = sadd.s32 1, %s499_s15  }
 0x215   : > { %p11_p4 = scmp.ge.s32.totalorder %s14_s15, 4  }
 0x217   :  { %13 = sbr.rel (!%p11_p4) target bundleno = 1 (0x1), region = 66 }

</bundles_post_ra>
